<compile_context>
chip_gen: v6e
topology: v6e:2x2x1
jax: 0.10.0
libtpu: 0.0.40
codegen_flags: <defaults>
</compile_context>

<pallas_src>
import functools

import jax
import jax.numpy as jnp
import numpy as np
from jax.experimental import pallas as pl
from jax.experimental.pallas import tpu as pltpu

EPS = 1e-5       # PyTorch BatchNorm2d default eps
_PAY_OFF = 16    # payload row offset inside the halo scratch (sublane-aligned
                 # for f32 (8-row tiles) and packed bf16 (16-row tiles))


def _residual_block_kernel(last_relu, x_ref, wa_ref, wb_ref,
                           ga_ref, ba_ref, gb_ref, bb_ref, pool_ref,
                           out_ref, pad_ref):
    """Whole residual block in one invocation (everything fits in VMEM).

    x_ref   : (N, H, W*C) f32   input, lane-packed (lane index = w*C + c)
    wa_ref  : (3, W*C, W*C)     conv_a block-Toeplitz weight, one block per dy tap
    wb_ref  : (3, W*C, W*C)     conv_b block-Toeplitz weight
    ga/ba   : (1, W*C) f32      bn_a gamma / beta, tiled over W
    gb/bb   : (1, W*C) f32      bn_b gamma / beta, tiled over W
    pool_ref: (W*C, W*C) f32    channel-pool P[a,b] = (a%C == b%C) / (N*H*W)
    out_ref : (N, H, W*C) f32
    pad_ref : VMEM scratch (N, H + 2*_PAY_OFF, W*C) in the conv dtype; payload
              at rows _PAY_OFF.._PAY_OFF+H-1, zero halo rows above / below
              (reused by both convs).
    """
    N, H, WC = x_ref.shape
    NH = N * H
    OFF = _PAY_OFF
    cdt = pad_ref.dtype
    pool = pool_ref[...]

    def conv3x3(w_ref):
        # dy taps = 3 sublane-offset slabs of the halo scratch; dx taps and the
        # W-direction zero padding are folded into the block-Toeplitz weight.
        # Three accumulating matmuls (f32 accumulation), no concat temporary.
        acc = jnp.dot(pad_ref[:, OFF - 1:OFF - 1 + H, :].reshape(NH, WC),
                      w_ref[0], preferred_element_type=jnp.float32)
        acc += jnp.dot(pad_ref[:, OFF:OFF + H, :].reshape(NH, WC),
                       w_ref[1], preferred_element_type=jnp.float32)
        acc += jnp.dot(pad_ref[:, OFF + 1:OFF + 1 + H, :].reshape(NH, WC),
                       w_ref[2], preferred_element_type=jnp.float32)
        return acc                                            # (NH, WC) f32

    def batchnorm(v, gamma, beta):
        # Training-mode per-channel stats over (N, H, W), all in f32: sublane
        # reduce to [sum; sum_sq] (2, WC), then ONE channel-pool matmul folds +
        # broadcasts across the W lane replicas and applies the 1/(N*H*W)
        # factor (pre-baked into `pool`).  Affine folded into scale/shift.
        s = jnp.concatenate([jnp.sum(v, axis=0, keepdims=True),
                             jnp.sum(v * v, axis=0, keepdims=True)], axis=0)
        stats = jnp.dot(s, pool, preferred_element_type=jnp.float32)  # (2, WC)
        mean = stats[0:1, :]
        var = stats[1:2, :] - mean * mean                     # biased variance
        scale = gamma * jax.lax.rsqrt(var + EPS)
        shift = beta - mean * scale
        return v * scale + shift

    x = x_ref[...]                                            # (N, H, WC) f32

    # One-time halo zeroing: aligned 2-row bands just above / below the
    # payload; only rows OFF-1 and OFF+H are ever read, and they stay zero
    # for both convs.
    zband = jnp.zeros((N, 2, WC), cdt)
    pad_ref[:, OFF - 2:OFF, :] = zband
    pad_ref[:, OFF + H:OFF + H + 2, :] = zband

    # ---- conv_a -> bn_a -> relu
    pad_ref[:, OFF:OFF + H, :] = x.astype(cdt)                # aligned store
    ya = conv3x3(wa_ref)
    ya = jnp.maximum(batchnorm(ya, ga_ref[...], ba_ref[...]), 0.0)

    # ---- conv_b -> bn_b
    pad_ref[:, OFF:OFF + H, :] = ya.reshape(N, H, WC).astype(cdt)
    yb = batchnorm(conv3x3(wb_ref), gb_ref[...], bb_ref[...])

    # ---- identity shortcut (increase_dim=False); residual add in f32
    out = x.reshape(NH, WC) + yb
    if last_relu:
        out = jnp.maximum(out, 0.0)
    out_ref[...] = out.reshape(N, H, WC)


def _block_conv_weight(w_hwio, width):
    """(3,3,Cin,Cout) HWIO taps -> (3, W*Cin, W*Cout) block-Toeplitz blocks.

    Block ky, row = w_src*Cin + ci, col = w_dst*Cout + co.  The dx taps and the
    W-direction zero padding are folded in, so each dy tap of the 3x3 conv
    becomes one (W*Cin, W*Cout) matmul against the ky-shifted input slab.
    """
    kH, kW, cin, cout = w_hwio.shape
    # shift[x, p, w] = 1 iff p == w + x - 1  (source column p feeds output
    # column w through tap dx=x; out-of-range source columns vanish, which is
    # exactly zero padding in W).
    shift = jnp.stack(
        [jnp.eye(width, k=1 - x, dtype=w_hwio.dtype) for x in range(kW)])
    blk = jnp.einsum('dxio,xpw->dpiwo', w_hwio, shift)
    return blk.reshape(kH, width * cin, width * cout)


def residual_block(x_nchw, wa_hwio, ga, ba, wb_hwio, gb, bb, *,
                   last_relu=False, conv_dtype=jnp.bfloat16):
    """x_nchw: (N,C,H,W) f32; wa/wb: (3,3,C,C) HWIO; ga/ba/gb/bb: (C,).

    conv_dtype: dtype of the conv matmul operands (activations + block-Toeplitz
    weights).  bfloat16 gets the full MXU rate on v6e/v7x; accumulation and all
    BN / residual math stay float32 either way.
    """
    N, C, H, W = x_nchw.shape
    WC = W * C

    # Lane-packed layout: (N, H, W*C) with W*C on the 128-lane axis.
    x = jnp.transpose(x_nchw, (0, 2, 3, 1)).reshape(N, H, WC)

    wa_blk = _block_conv_weight(wa_hwio, W).astype(conv_dtype)   # (3, WC, WC)
    wb_blk = _block_conv_weight(wb_hwio, W).astype(conv_dtype)

    # Channel-pool matrix with the BN 1/(N*H*W) factor pre-folded in.
    ch = jnp.arange(WC) % C
    pool = (ch[:, None] == ch[None, :]).astype(jnp.float32) / (N * H * W)

    def tile_c(v):  # per-channel vector -> lane-packed (1, W*C) f32
        return jnp.tile(v.reshape(1, C).astype(jnp.float32), (1, W))

    vmem = pl.BlockSpec(memory_space=pltpu.MemorySpace.VMEM)
    out = pl.pallas_call(
        functools.partial(_residual_block_kernel, last_relu),
        out_shape=jax.ShapeDtypeStruct((N, H, WC), jnp.float32),
        in_specs=[vmem] * 8,
        out_specs=vmem,
        scratch_shapes=[pltpu.VMEM((N, H + 2 * _PAY_OFF, WC), conv_dtype)],
        compiler_params=pltpu.CompilerParams(
            vmem_limit_bytes=32 * 1024 * 1024),
    )(x, wa_blk, wb_blk, tile_c(ga), tile_c(ba), tile_c(gb), tile_c(bb), pool)

    return jnp.transpose(out.reshape(N, H, W, C), (0, 3, 1, 2))  # back to NCHW


def _reference(x_nchw, wa_hwio, ga, ba, wb_hwio, gb, bb, *, last_relu=False):
    """Pure-JAX reference (matches PyTorch train-mode ResidualBlock forward)."""
    x = jnp.transpose(x_nchw, (0, 2, 3, 1))

    def conv(v, w):
        return jax.lax.conv_general_dilated(
            v, w, window_strides=(1, 1), padding="SAME",
            dimension_numbers=("NHWC", "HWIO", "NHWC"))

    def bn(v, g, b):
        m = jnp.mean(v, axis=(0, 1, 2), keepdims=True)
        va = jnp.mean((v - m) ** 2, axis=(0, 1, 2), keepdims=True)
        return (v - m) * jax.lax.rsqrt(va + EPS) * g + b

    y = jnp.maximum(bn(conv(x, wa_hwio), ga, ba), 0.0)
    y = bn(conv(y, wb_hwio), gb, bb)
    y = x + y
    if last_relu:
        y = jnp.maximum(y, 0.0)
    return jnp.transpose(y, (0, 3, 1, 2))


if __name__ == "__main__":
    key = jax.random.PRNGKey(0)
    N, C, H, W = 2, 8, 16, 16   # inplanes=8, increase_dim=False; W*C = 128

    k1, k2, k3, k4, k5, k6 = jax.random.split(key, 6)
    x = jax.random.normal(k1, (N, C, H, W), jnp.float32)
    # Conv weights stored HWIO (conceptually w_oihw.transpose(2, 3, 1, 0)).
    wa = jax.random.normal(k2, (3, 3, C, C), jnp.float32) * 0.1
    wb = jax.random.normal(k3, (3, 3, C, C), jnp.float32) * 0.1
    # BatchNorm affine params (deterministic, non-trivial).
    ga = 1.0 + 0.1 * jax.random.normal(k4, (C,), jnp.float32)
    ba = 0.1 * jax.random.normal(k5, (C,), jnp.float32)
    gb = 1.0 + 0.1 * jax.random.normal(k6, (C,), jnp.float32)
    bb = jnp.zeros((C,), jnp.float32)

    ref = _reference(x, wa, ga, ba, wb, gb, bb, last_relu=False)

    # Full-precision conv path: validates the algorithm at tight tolerance.
    out_f32 = jax.block_until_ready(
        residual_block(x, wa, ga, ba, wb, gb, bb, last_relu=False,
                       conv_dtype=jnp.float32))
    np.testing.assert_allclose(np.asarray(out_f32), np.asarray(ref),
                               rtol=1e-3, atol=1e-3)

    # Default bf16 conv-operand path (v6e/v7x MXU rate).  BN statistics,
    # accumulation and the residual add stay f32, so only the ~2^-9 operand
    # rounding shows up -> looser tolerance for this check.
    out_bf16 = jax.block_until_ready(
        residual_block(x, wa, ga, ba, wb, gb, bb, last_relu=False))
    np.testing.assert_allclose(np.asarray(out_bf16), np.asarray(ref),
                               rtol=3e-2, atol=5e-2)

    print("KERNEL_OK")
</pallas_src>

<mosaic_0001>
module attributes {stable_mosaic.version = 11 : i64} {
  func.func @_residual_block_kernel(%arg0: memref<2x16x128xf32, #tpu.memory_space<vmem>>, %arg1: memref<3x128x128xf32, #tpu.memory_space<vmem>>, %arg2: memref<3x128x128xf32, #tpu.memory_space<vmem>>, %arg3: memref<1x128xf32, #tpu.memory_space<vmem>>, %arg4: memref<1x128xf32, #tpu.memory_space<vmem>>, %arg5: memref<1x128xf32, #tpu.memory_space<vmem>>, %arg6: memref<1x128xf32, #tpu.memory_space<vmem>>, %arg7: memref<128x128xf32, #tpu.memory_space<vmem>>, %arg8: memref<2x16x128xf32, #tpu.memory_space<vmem>>, %arg9: memref<2x48x128xf32, #tpu.memory_space<vmem>>) attributes {dimension_semantics = [], scalar_prefetch = 0 : i64, scratch_operands = 1 : i64, tpu.core_type = #tpu.core_type<tc>} {
    %c0 = arith.constant 0 : index
    %c0_0 = arith.constant 0 : index
    %0 = vector.load %arg7[%c0, %c0_0] : memref<128x128xf32, #tpu.memory_space<vmem>>, vector<128x128xf32>
    %c0_1 = arith.constant 0 : index
    %c0_2 = arith.constant 0 : index
    %c0_3 = arith.constant 0 : index
    %1 = vector.load %arg0[%c0_1, %c0_2, %c0_3] : memref<2x16x128xf32, #tpu.memory_space<vmem>>, vector<2x16x128xf32>
    %cst = arith.constant 0.000000e+00 : f32
    %2 = vector.broadcast %cst : f32 to vector<2x2x128xf32>
    %c0_4 = arith.constant 0 : index
    %c14 = arith.constant 14 : index
    %c0_5 = arith.constant 0 : index
    %3 = vector.load %arg9[%c0_4, %c14, %c0_5] : memref<2x48x128xf32, #tpu.memory_space<vmem>>, vector<2x2x128xf32>
    tpu.vector_store %arg9[%c0_4, %c14, %c0_5], %2 {strides = array<i32>} : memref<2x48x128xf32, #tpu.memory_space<vmem>>, vector<2x2x128xf32>,
    %c0_6 = arith.constant 0 : index
    %c32 = arith.constant 32 : index
    %c0_7 = arith.constant 0 : index
    %4 = vector.load %arg9[%c0_6, %c32, %c0_7] : memref<2x48x128xf32, #tpu.memory_space<vmem>>, vector<2x2x128xf32>
    tpu.vector_store %arg9[%c0_6, %c32, %c0_7], %2 {strides = array<i32>} : memref<2x48x128xf32, #tpu.memory_space<vmem>>, vector<2x2x128xf32>,
    %c0_8 = arith.constant 0 : index
    %c16 = arith.constant 16 : index
    %c0_9 = arith.constant 0 : index
    %5 = vector.load %arg9[%c0_8, %c16, %c0_9] : memref<2x48x128xf32, #tpu.memory_space<vmem>>, vector<2x16x128xf32>
    tpu.vector_store %arg9[%c0_8, %c16, %c0_9], %1 {strides = array<i32>} : memref<2x48x128xf32, #tpu.memory_space<vmem>>, vector<2x16x128xf32>,
    %c0_10 = arith.constant 0 : index
    %c15 = arith.constant 15 : index
    %c0_11 = arith.constant 0 : index
    %6 = vector.load %arg9[%c0_10, %c15, %c0_11] : memref<2x48x128xf32, #tpu.memory_space<vmem>>, vector<2x16x128xf32>
    %7 = vector.shape_cast %6 : vector<2x16x128xf32> to vector<32x128xf32>
    %c0_12 = arith.constant 0 : index
    %c0_13 = arith.constant 0 : index
    %c0_14 = arith.constant 0 : index
    %8 = vector.load %arg1[%c0_12, %c0_13, %c0_14] : memref<3x128x128xf32, #tpu.memory_space<vmem>>, vector<1x128x128xf32>
    %9 = vector.shape_cast %8 : vector<1x128x128xf32> to vector<128x128xf32>
    %cst_15 = arith.constant dense<0.000000e+00> : vector<32x128xf32>
    %10 = tpu.matmul %7, %9, %cst_15 {dimension_numbers = #tpu.dot_dimension_numbers<[1], [0], [0], [1], [0, 0, 1, 1], [], []>} : vector<32x128xf32>, vector<128x128xf32>, vector<32x128xf32> -> vector<32x128xf32>
    %c0_16 = arith.constant 0 : index
    %c16_17 = arith.constant 16 : index
    %c0_18 = arith.constant 0 : index
    %11 = vector.load %arg9[%c0_16, %c16_17, %c0_18] : memref<2x48x128xf32, #tpu.memory_space<vmem>>, vector<2x16x128xf32>
    %12 = vector.shape_cast %11 : vector<2x16x128xf32> to vector<32x128xf32>
    %c1 = arith.constant 1 : index
    %c0_19 = arith.constant 0 : index
    %c0_20 = arith.constant 0 : index
    %13 = vector.load %arg1[%c1, %c0_19, %c0_20] : memref<3x128x128xf32, #tpu.memory_space<vmem>>, vector<1x128x128xf32>
    %14 = vector.shape_cast %13 : vector<1x128x128xf32> to vector<128x128xf32>
    %cst_21 = arith.constant dense<0.000000e+00> : vector<32x128xf32>
    %15 = tpu.matmul %12, %14, %cst_21 {dimension_numbers = #tpu.dot_dimension_numbers<[1], [0], [0], [1], [0, 0, 1, 1], [], []>} : vector<32x128xf32>, vector<128x128xf32>, vector<32x128xf32> -> vector<32x128xf32>
    %16 = arith.addf %10, %15 : vector<32x128xf32>
    %c0_22 = arith.constant 0 : index
    %c17 = arith.constant 17 : index
    %c0_23 = arith.constant 0 : index
    %17 = vector.load %arg9[%c0_22, %c17, %c0_23] : memref<2x48x128xf32, #tpu.memory_space<vmem>>, vector<2x16x128xf32>
    %18 = vector.shape_cast %17 : vector<2x16x128xf32> to vector<32x128xf32>
    %c2 = arith.constant 2 : index
    %c0_24 = arith.constant 0 : index
    %c0_25 = arith.constant 0 : index
    %19 = vector.load %arg1[%c2, %c0_24, %c0_25] : memref<3x128x128xf32, #tpu.memory_space<vmem>>, vector<1x128x128xf32>
    %20 = vector.shape_cast %19 : vector<1x128x128xf32> to vector<128x128xf32>
    %cst_26 = arith.constant dense<0.000000e+00> : vector<32x128xf32>
    %21 = tpu.matmul %18, %20, %cst_26 {dimension_numbers = #tpu.dot_dimension_numbers<[1], [0], [0], [1], [0, 0, 1, 1], [], []>} : vector<32x128xf32>, vector<128x128xf32>, vector<32x128xf32> -> vector<32x128xf32>
    %22 = arith.addf %16, %21 : vector<32x128xf32>
    %c0_27 = arith.constant 0 : index
    %c0_28 = arith.constant 0 : index
    %23 = vector.load %arg3[%c0_27, %c0_28] : memref<1x128xf32, #tpu.memory_space<vmem>>, vector<1x128xf32>
    %c0_29 = arith.constant 0 : index
    %c0_30 = arith.constant 0 : index
    %24 = vector.load %arg4[%c0_29, %c0_30] : memref<1x128xf32, #tpu.memory_space<vmem>>, vector<1x128xf32>
    %cst_31 = arith.constant dense<0.000000e+00> : vector<128xf32>
    %25 = vector.multi_reduction <add>, %22, %cst_31 [0] : vector<32x128xf32> to vector<128xf32>
    %26 = vector.shape_cast %25 : vector<128xf32> to vector<1x128xf32>
    %27 = arith.mulf %22, %22 : vector<32x128xf32>
    %cst_32 = arith.constant dense<0.000000e+00> : vector<128xf32>
    %28 = vector.multi_reduction <add>, %27, %cst_32 [0] : vector<32x128xf32> to vector<128xf32>
    %29 = vector.shape_cast %28 : vector<128xf32> to vector<1x128xf32>
    %30 = tpu.concatenate %26, %29 in 0 : vector<1x128xf32>, vector<1x128xf32> -> vector<2x128xf32>
    %cst_33 = arith.constant dense<0.000000e+00> : vector<2x128xf32>
    %31 = tpu.matmul %30, %0, %cst_33 {dimension_numbers = #tpu.dot_dimension_numbers<[1], [0], [0], [1], [0, 0, 1, 1], [], []>} : vector<2x128xf32>, vector<128x128xf32>, vector<2x128xf32> -> vector<2x128xf32>
    %32 = vector.extract_strided_slice %31 {offsets = [0, 0], sizes = [1, 128], strides = [1, 1]} : vector<2x128xf32> to vector<1x128xf32>
    %33 = vector.extract_strided_slice %31 {offsets = [1, 0], sizes = [1, 128], strides = [1, 1]} : vector<2x128xf32> to vector<1x128xf32>
    %34 = arith.mulf %32, %32 : vector<1x128xf32>
    %35 = arith.subf %33, %34 : vector<1x128xf32>
    %cst_34 = arith.constant 9.99999974E-6 : f32
    %36 = vector.broadcast %cst_34 : f32 to vector<1x128xf32>
    %37 = arith.addf %35, %36 : vector<1x128xf32>
    %38 = math.rsqrt %37 : vector<1x128xf32>
    %39 = arith.mulf %23, %38 : vector<1x128xf32>
    %40 = arith.mulf %32, %39 : vector<1x128xf32>
    %41 = arith.subf %24, %40 : vector<1x128xf32>
    %42 = vector.broadcast %39 : vector<1x128xf32> to vector<32x128xf32>
    %43 = arith.mulf %22, %42 : vector<32x128xf32>
    %44 = vector.broadcast %41 : vector<1x128xf32> to vector<32x128xf32>
    %45 = arith.addf %43, %44 : vector<32x128xf32>
    %cst_35 = arith.constant 0.000000e+00 : f32
    %46 = vector.broadcast %cst_35 : f32 to vector<32x128xf32>
    %47 = arith.maximumf %45, %46 : vector<32x128xf32>
    %48 = vector.shape_cast %47 : vector<32x128xf32> to vector<2x16x128xf32>
    %c0_36 = arith.constant 0 : index
    %c16_37 = arith.constant 16 : index
    %c0_38 = arith.constant 0 : index
    %49 = vector.load %arg9[%c0_36, %c16_37, %c0_38] : memref<2x48x128xf32, #tpu.memory_space<vmem>>, vector<2x16x128xf32>
    tpu.vector_store %arg9[%c0_36, %c16_37, %c0_38], %48 {strides = array<i32>} : memref<2x48x128xf32, #tpu.memory_space<vmem>>, vector<2x16x128xf32>,
    %c0_39 = arith.constant 0 : index
    %c15_40 = arith.constant 15 : index
    %c0_41 = arith.constant 0 : index
    %50 = vector.load %arg9[%c0_39, %c15_40, %c0_41] : memref<2x48x128xf32, #tpu.memory_space<vmem>>, vector<2x16x128xf32>
    %51 = vector.shape_cast %50 : vector<2x16x128xf32> to vector<32x128xf32>
    %c0_42 = arith.constant 0 : index
    %c0_43 = arith.constant 0 : index
    %c0_44 = arith.constant 0 : index
    %52 = vector.load %arg2[%c0_42, %c0_43, %c0_44] : memref<3x128x128xf32, #tpu.memory_space<vmem>>, vector<1x128x128xf32>
    %53 = vector.shape_cast %52 : vector<1x128x128xf32> to vector<128x128xf32>
    %cst_45 = arith.constant dense<0.000000e+00> : vector<32x128xf32>
    %54 = tpu.matmul %51, %53, %cst_45 {dimension_numbers = #tpu.dot_dimension_numbers<[1], [0], [0], [1], [0, 0, 1, 1], [], []>} : vector<32x128xf32>, vector<128x128xf32>, vector<32x128xf32> -> vector<32x128xf32>
    %c0_46 = arith.constant 0 : index
    %c16_47 = arith.constant 16 : index
    %c0_48 = arith.constant 0 : index
    %55 = vector.load %arg9[%c0_46, %c16_47, %c0_48] : memref<2x48x128xf32, #tpu.memory_space<vmem>>, vector<2x16x128xf32>
    %56 = vector.shape_cast %55 : vector<2x16x128xf32> to vector<32x128xf32>
    %c1_49 = arith.constant 1 : index
    %c0_50 = arith.constant 0 : index
    %c0_51 = arith.constant 0 : index
    %57 = vector.load %arg2[%c1_49, %c0_50, %c0_51] : memref<3x128x128xf32, #tpu.memory_space<vmem>>, vector<1x128x128xf32>
    %58 = vector.shape_cast %57 : vector<1x128x128xf32> to vector<128x128xf32>
    %cst_52 = arith.constant dense<0.000000e+00> : vector<32x128xf32>
    %59 = tpu.matmul %56, %58, %cst_52 {dimension_numbers = #tpu.dot_dimension_numbers<[1], [0], [0], [1], [0, 0, 1, 1], [], []>} : vector<32x128xf32>, vector<128x128xf32>, vector<32x128xf32> -> vector<32x128xf32>
    %60 = arith.addf %54, %59 : vector<32x128xf32>
    %c0_53 = arith.constant 0 : index
    %c17_54 = arith.constant 17 : index
    %c0_55 = arith.constant 0 : index
    %61 = vector.load %arg9[%c0_53, %c17_54, %c0_55] : memref<2x48x128xf32, #tpu.memory_space<vmem>>, vector<2x16x128xf32>
    %62 = vector.shape_cast %61 : vector<2x16x128xf32> to vector<32x128xf32>
    %c2_56 = arith.constant 2 : index
    %c0_57 = arith.constant 0 : index
    %c0_58 = arith.constant 0 : index
    %63 = vector.load %arg2[%c2_56, %c0_57, %c0_58] : memref<3x128x128xf32, #tpu.memory_space<vmem>>, vector<1x128x128xf32>
    %64 = vector.shape_cast %63 : vector<1x128x128xf32> to vector<128x128xf32>
    %cst_59 = arith.constant dense<0.000000e+00> : vector<32x128xf32>
    %65 = tpu.matmul %62, %64, %cst_59 {dimension_numbers = #tpu.dot_dimension_numbers<[1], [0], [0], [1], [0, 0, 1, 1], [], []>} : vector<32x128xf32>, vector<128x128xf32>, vector<32x128xf32> -> vector<32x128xf32>
    %66 = arith.addf %60, %65 : vector<32x128xf32>
    %c0_60 = arith.constant 0 : index
    %c0_61 = arith.constant 0 : index
    %67 = vector.load %arg5[%c0_60, %c0_61] : memref<1x128xf32, #tpu.memory_space<vmem>>, vector<1x128xf32>
    %c0_62 = arith.constant 0 : index
    %c0_63 = arith.constant 0 : index
    %68 = vector.load %arg6[%c0_62, %c0_63] : memref<1x128xf32, #tpu.memory_space<vmem>>, vector<1x128xf32>
    %cst_64 = arith.constant dense<0.000000e+00> : vector<128xf32>
    %69 = vector.multi_reduction <add>, %66, %cst_64 [0] : vector<32x128xf32> to vector<128xf32>
    %70 = vector.shape_cast %69 : vector<128xf32> to vector<1x128xf32>
    %71 = arith.mulf %66, %66 : vector<32x128xf32>
    %cst_65 = arith.constant dense<0.000000e+00> : vector<128xf32>
    %72 = vector.multi_reduction <add>, %71, %cst_65 [0] : vector<32x128xf32> to vector<128xf32>
    %73 = vector.shape_cast %72 : vector<128xf32> to vector<1x128xf32>
    %74 = tpu.concatenate %70, %73 in 0 : vector<1x128xf32>, vector<1x128xf32> -> vector<2x128xf32>
    %cst_66 = arith.constant dense<0.000000e+00> : vector<2x128xf32>
    %75 = tpu.matmul %74, %0, %cst_66 {dimension_numbers = #tpu.dot_dimension_numbers<[1], [0], [0], [1], [0, 0, 1, 1], [], []>} : vector<2x128xf32>, vector<128x128xf32>, vector<2x128xf32> -> vector<2x128xf32>
    %76 = vector.extract_strided_slice %75 {offsets = [0, 0], sizes = [1, 128], strides = [1, 1]} : vector<2x128xf32> to vector<1x128xf32>
    %77 = vector.extract_strided_slice %75 {offsets = [1, 0], sizes = [1, 128], strides = [1, 1]} : vector<2x128xf32> to vector<1x128xf32>
    %78 = arith.mulf %76, %76 : vector<1x128xf32>
    %79 = arith.subf %77, %78 : vector<1x128xf32>
    %cst_67 = arith.constant 9.99999974E-6 : f32
    %80 = vector.broadcast %cst_67 : f32 to vector<1x128xf32>
    %81 = arith.addf %79, %80 : vector<1x128xf32>
    %82 = math.rsqrt %81 : vector<1x128xf32>
    %83 = arith.mulf %67, %82 : vector<1x128xf32>
    %84 = arith.mulf %76, %83 : vector<1x128xf32>
    %85 = arith.subf %68, %84 : vector<1x128xf32>
    %86 = vector.broadcast %83 : vector<1x128xf32> to vector<32x128xf32>
    %87 = arith.mulf %66, %86 : vector<32x128xf32>
    %88 = vector.broadcast %85 : vector<1x128xf32> to vector<32x128xf32>
    %89 = arith.addf %87, %88 : vector<32x128xf32>
    %90 = vector.shape_cast %1 : vector<2x16x128xf32> to vector<32x128xf32>
    %91 = arith.addf %90, %89 : vector<32x128xf32>
    %92 = vector.shape_cast %91 : vector<32x128xf32> to vector<2x16x128xf32>
    %c0_68 = arith.constant 0 : index
    %c0_69 = arith.constant 0 : index
    %c0_70 = arith.constant 0 : index
    %93 = vector.load %arg8[%c0_68, %c0_69, %c0_70] : memref<2x16x128xf32, #tpu.memory_space<vmem>>, vector<2x16x128xf32>
    tpu.vector_store %arg8[%c0_68, %c0_69, %c0_70], %92 {strides = array<i32>} : memref<2x16x128xf32, #tpu.memory_space<vmem>>, vector<2x16x128xf32>,
    return
  }
}

</mosaic_0001>

<bundles_post_ra>
// kernel: tpu_custom_call.1
= control target key start
LH: loop header
LB: loop body
LE: loop exit
PB: predicated region body
PF: predicated region fallthrough
CT: control target
= control target key end

     0   :  { %13 = vsyncpa [#allocation4], 0  ;;  %s1908_s0 = inlined_call_operand.hbm [shape: f32[2,16,128], index: 0, kind: input, shape index: {}]   ;;  %s1909_s1 = inlined_call_operand.hbm [shape: f32[3,128,128], index: 1, kind: input, shape index: {}]   ;;  %s1910_s2 = inlined_call_operand.hbm [shape: f32[3,128,128], index: 2, kind: input, shape index: {}]   ;;  %s1911_s3 = inlined_call_operand.vmem [shape: f32[1,128], index: 3, kind: input, shape index: {}]   ;;  %s1912_s4 = inlined_call_operand.vmem [shape: f32[1,128], index: 4, kind: input, shape index: {}]   ;;  %s1913_s5 = inlined_call_operand.vmem [shape: f32[1,128], index: 5, kind: input, shape index: {}]   ;;  %s1914_s6 = inlined_call_operand.vmem [shape: f32[1,128], index: 6, kind: input, shape index: {}]   ;;  %s1915_s7 = inlined_call_operand.hbm [shape: f32[128,128], index: 7, kind: input, shape index: {}]   ;;  %s1916_s8 = inlined_call_operand.hbm [shape: f32[2,16,128], index: 8, kind: output, shape index: {}]  }
   0x1   :  { %14 = vsyncpa [#allocation7], 0 }
   0x2   :  { %15 = vsyncpa [#allocation10], 0 }
   0x3   :  { %16 = vsyncpa [#allocation5], 0  ;;  %s1649_s27 = smov [#allocation6]   ;;  %s1650_s29 = smov [#allocation3]  }
   0x4   :  { %s34_s28 = sshll.u32 %s1649_s27, 4  ;;  %s22_s30 = sshll.u32 %s1650_s29, 4  ;;  %s35_s28 = int_to_ptr.vmem [resolvable:$true] %s34_s28  ;;  %s23_s30 = int_to_ptr.vmem [resolvable:$true] %s22_s30 }
   0x5   :  { %s1549_s9 = scalar_lea.vmem %s35_s28, 6144  ;;  %p1554_p1 = scmp.lt.s32.totalorder %s35_s28, %s35_s28 }
   0x6   :  { %p1550_p0 = scmp.ne.s32.totalorder %s35_s28, %s1549_s9  ;;  %p1555_p2 = scmp.lt.s32.totalorder %s1549_s9, %s1549_s9 }
   0x8   :  { %p1556_p3 = por %p1555_p2, %p1554_p1 }
   0xa   :  { %p1557_p4 = pnand %p1556_p3, %p1550_p0 }
   0xc   :  { %1560 = shalt.err (!%p1557_p4)
}
   0xd   :  { %s1651_s10 = smov 128   ;;  %s1652_s11 = smov 8  }
   0xe   :  { %40 = dma.hbm_to_vmem [thread:$0]  %s1909_s1, 6144, %s35_s28, [#allocation7], %s1651_s10, %s1651_s10, %s1652_s11  }
   0xf   :  { %s1569_s14 = scalar_lea.vmem %s23_s30, 512  ;;  %p1574_p6 = scmp.lt.s32.totalorder %s23_s30, %s23_s30 }
  0x10   :  { %p1570_p5 = scmp.ne.s32.totalorder %s23_s30, %s1569_s14  ;;  %p1575_p7 = scmp.lt.s32.totalorder %s1569_s14, %s1569_s14 }
  0x12   :  { %p1576_p8 = por %p1575_p7, %p1574_p6 }
  0x14   :  { %p1577_p9 = pnand %p1576_p8, %p1570_p5 }
  0x16   :  { %1580 = shalt.err (!%p1577_p9)
}
  0x17   :  { %28 = dma.hbm_to_vmem [thread:$0]  %s1908_s0, 512, %s23_s30, [#allocation4], %s1651_s10, %s1651_s10, %s1652_s11  }
  0x18   :  { %s1653_s17 = smov [#allocation8]   ;;  %s1654_s19 = smov [#allocation9]  }
  0x19   :  { %s46_s18 = sshll.u32 %s1653_s17, 4  ;;  %s66_s20 = sshll.u32 %s1654_s19, 4  ;;  %s47_s18 = int_to_ptr.vmem [resolvable:$true] %s46_s18  ;;  %s67_s20 = int_to_ptr.vmem [resolvable:$true] %s66_s20 }
  0x1a   :  { %s1589_s1 = scalar_lea.vmem %s47_s18, 6144  ;;  %p1594_p11 = scmp.lt.s32.totalorder %s47_s18, %s47_s18 }
  0x1b   :  { %p1590_p10 = scmp.ne.s32.totalorder %s47_s18, %s1589_s1  ;;  %p1595_p12 = scmp.lt.s32.totalorder %s1589_s1, %s1589_s1 }
  0x1d   :  { %p1596_p13 = por %p1595_p12, %p1594_p11 }
  0x1f   :  { %p1597_p0 = pnand %p1596_p13, %p1590_p10 }
  0x21   :  { %1600 = shalt.err (!%p1597_p0)
}
  0x22   :  { %52 = dma.hbm_to_vmem [thread:$0]  %s1910_s2, 6144, %s47_s18, [#allocation7], %s1651_s10, %s1651_s10, %s1652_s11  }
  0x23   :  { %s1609_s0 = scalar_lea.vmem %s67_s20, 2048  ;;  %p1614_p2 = scmp.lt.s32.totalorder %s67_s20, %s67_s20 }
  0x24   :  { %p1610_p1 = scmp.ne.s32.totalorder %s67_s20, %s1609_s0  ;;  %p1615_p3 = scmp.lt.s32.totalorder %s1609_s0, %s1609_s0 }
  0x26   :  { %p1616_p4 = por %p1615_p3, %p1614_p2 }
  0x28   :  { %p1617_p5 = pnand %p1616_p4, %p1610_p1 }
  0x2a   :  { %1620 = shalt.err (!%p1617_p5)
}
  0x2b   :  { %72 = dma.hbm_to_vmem [thread:$0]  %s1915_s7, 2048, %s67_s20, [#allocation10], %s1651_s10, %s1651_s10, %s1652_s11  }
  0x2c   :  { %1641 = dma.done.wait [#allocation4], 512  }
  0x2d   :  { %1642 = vsyncadd [#allocation4], 4294966784 }
  0x2e   :  { %1643 = dma.done.wait [#allocation7], 12288  }
  0x2f   :  { %1644 = vsyncadd [#allocation7], 4294955008 }
  0x30   :  { %1645 = dma.done.wait [#allocation10], 2048  }
  0x31   :  { %1646 = vsyncadd [#allocation10], 4294965248  ;;  %v1655_v0 = vmov 0.0   ;;  %v153_v1 = vld [vmem:[#allocation6 + $0xf8] sm:$0xff]  ;;  %v152_v3 = vld [vmem:[#allocation6 + $0xf0] sm:$0xff]  ;;  %vm1656_vm0 = vmmov 0  }
  0x32   :  { %105 = vst [vmem:[#allocation2 + $0xe] sm:$0x3] %v1655_v0  ;;  %106 = vst [vmem:[#allocation2 + $0x3e] sm:$0x3] %v1655_v0  ;;  %v132_v2 = vld [vmem:[#allocation6 + $0x78] sm:$0xff]  ;;  %1229 = vmatprep.subr.mxu0 %v153_v1  ;;  %v131_v4 = vld [vmem:[#allocation6 + $0x70] sm:$0xff] }
  0x33   :  { %107 = vst [vmem:[#allocation2 + $0x20] sm:$0x3] %v1655_v0  ;;  %108 = vst [vmem:[#allocation2 + $0x50] sm:$0x3] %v1655_v0  ;;  %1267 = vmatprep.subr.mxu1 %v132_v2  ;;  %1230 = vmatpush3.msra.mxu0 %v153_v1  ;;  %v151_v5 = vld [vmem:[#allocation6 + $0xe8] sm:$0xff]  ;;  %v150_v7 = vld [vmem:[#allocation6 + $0xe0] sm:$0xff] }
  0x34   :  { %1268 = vmatpush3.msra.mxu1 %v132_v2  ;;  %v130_v6 = vld [vmem:[#allocation6 + $0x68] sm:$0xff]  ;;  %1231 = vmatprep.subr.mxu0 %v152_v3  ;;  %v129_v8 = vld [vmem:[#allocation6 + $0x60] sm:$0xff]  ;;  %v149_v9 = vld [vmem:[#allocation6 + $0xd8] sm:$0xff]  ;;  %vm458_vm1 = vcmask 1040384   ;;  %s1658_s29 = smov [#allocation11]  }
  0x35   :  { %1269 = vmatprep.subr.mxu1 %v131_v4  ;;  %1232 = vmatpush3.msra.mxu0 %v152_v3  ;;  %v128_v10 = vld [vmem:[#allocation6 + $0x58] sm:$0xff]  ;;  %v148_v11 = vld [vmem:[#allocation6 + $0xd0] sm:$0xff]  ;;  %v147_v13 = vld [vmem:[#allocation6 + $0xc8] sm:$0xff]  ;;  %s1061_s30 = sshll.u32 %s1658_s29, 4  ;;  %s1062_s30 = int_to_ptr.vmem [resolvable:$true] %s1061_s30 }
  0x36   :  { %1270 = vmatpush3.msra.mxu1 %v131_v4  ;;  %1233 = vmatprep.subr.mxu0 %v151_v5  ;;  %v127_v12 = vld [vmem:[#allocation6 + $0x50] sm:$0xff]  ;;  %v126_v14 = vld [vmem:[#allocation6 + $0x48] sm:$0xff]  ;;  %v1732_v15 = vld [vmem:[#allocation3] sm:$0xff]  ;;  %p1626_p7 = scmp.lt.s32.totalorder %s1062_s30, %s1062_s30 }
  0x37   :  { %1271 = vmatprep.subr.mxu1 %v130_v6  ;;  %1234 = vmatpush3.msra.mxu0 %v151_v5  ;;  %109 = vst [vmem:[#allocation2 + $0x10] sm:$0xff] %v1732_v15  ;;  %v1735_v16 = vld [vmem:[#allocation3 + $0x8] sm:$0xff]  ;;  %v146_v17 = vld [vmem:[#allocation6 + $0xc0] sm:$0xff]  ;;  %v145_v19 = vld [vmem:[#allocation6 + $0xb8] sm:$0xff] }
  0x38   :  { %1272 = vmatpush3.msra.mxu1 %v130_v6  ;;  %1235 = vmatprep.subr.mxu0 %v150_v7  ;;  %v125_v18 = vld [vmem:[#allocation6 + $0x40] sm:$0xff]  ;;  %110 = vst [vmem:[#allocation2 + $0x18] sm:$0xff] %v1735_v16  ;;  %v124_v20 = vld [vmem:[#allocation6 + $0x38] sm:$0xff]  ;;  %v1738_v21 = vld [vmem:[#allocation3 + $0x10] sm:$0xff] }
  0x39   :  { %1273 = vmatprep.subr.mxu1 %v129_v8  ;;  %1236 = vmatpush3.msra.mxu0 %v150_v7  ;;  %v144_v22 = vld [vmem:[#allocation6 + $0xb0] sm:$0xff]  ;;  %111 = vst [vmem:[#allocation2 + $0x40] sm:$0xff] %v1738_v21  ;;  %v1741_v24 = vld [vmem:[#allocation3 + $0x18] sm:$0xff]  ;;  %v143_v25 = vld [vmem:[#allocation6 + $0xa8] sm:$0xff] }
  0x3a   :  { %1274 = vmatpush3.msra.mxu1 %v129_v8  ;;  %1237 = vmatprep.subr.mxu0 %v149_v9  ;;  %v123_v23 = vld [vmem:[#allocation6 + $0x30] sm:$0xff]  ;;  %112 = vst [vmem:[#allocation2 + $0x48] sm:$0xff] %v1741_v24  ;;  %v122_v26 = vld [vmem:[#allocation6 + $0x28] sm:$0xff]  ;;  %v142_v27 = vld [vmem:[#allocation6 + $0xa0] sm:$0xff] }
  0x3b   :  { %1275 = vmatprep.subr.mxu1 %v128_v10  ;;  %1238 = vmatpush3.msra.mxu0 %v149_v9  ;;  %v121_v28 = vld [vmem:[#allocation6 + $0x20] sm:$0xff]  ;;  %v141_v29 = vld [vmem:[#allocation6 + $0x98] sm:$0xff]  ;;  %v140_v31 = vld [vmem:[#allocation6 + $0x90] sm:$0xff] }
  0x3c   :  { %1276 = vmatpush3.msra.mxu1 %v128_v10  ;;  %1239 = vmatprep.subr.mxu0 %v148_v11  ;;  %v120_v30 = vld [vmem:[#allocation6 + $0x18] sm:$0xff]  ;;  %v119_v32 = vld [vmem:[#allocation6 + $0x10] sm:$0xff]  ;;  %v139_v33 = vld [vmem:[#allocation6 + $0x88] sm:$0xff] }
  0x3d   :  { %1277 = vmatprep.subr.mxu1 %v127_v12  ;;  %1240 = vmatpush3.msra.mxu0 %v148_v11  ;;  %v118_v34 = vld [vmem:[#allocation6 + $0x8] sm:$0xff]  ;;  %v138_v35 = vld [vmem:[#allocation6 + $0x80] sm:$0xff]  ;;  %v344_v39 = vld [vmem:[#allocation6 + $0x178] sm:$0xff] }
  0x3e   :  { %1278 = vmatpush3.msra.mxu1 %v127_v12  ;;  %1241 = vmatprep.subr.mxu0 %v147_v13  ;;  %v117_v36 = vld [vmem:[#allocation6] sm:$0xff]  ;;  %v113_v37 = vld [vmem:[#allocation2 + $0xf] sm:$0xff]  ;;  %v340_v46 = vld [vmem:[#allocation6 + $0x158] sm:$0xff] }
  0x3f   :  { %1279 = vmatprep.subr.mxu1 %v126_v14  ;;  %1242 = vmatpush3.msra.mxu0 %v147_v13  ;;  %v114_v38 = vld [vmem:[#allocation2 + $0x17] sm:$0xff]  ;;  %v342_v43 = vld [vmem:[#allocation6 + $0x168] sm:$0xff]  ;;  %v341_v45 = vld [vmem:[#allocation6 + $0x160] sm:$0xff] }
  0x40   :  { %1280 = vmatpush3.msra.mxu1 %v126_v14  ;;  %1243 = vmatprep.subr.mxu0 %v146_v17  ;;  %v115_v40 = vld [vmem:[#allocation2 + $0x3f] sm:$0xff]  ;;  %v343_v41 = vld [vmem:[#allocation6 + $0x170] sm:$0xff]  ;;  %v338_v48 = vld [vmem:[#allocation6 + $0x148] sm:$0xff] }
  0x41   :  { %1281 = vmatprep.subr.mxu1 %v125_v18  ;;  %1244 = vmatpush3.msra.mxu0 %v146_v17  ;;  %v116_v42 = vld [vmem:[#allocation2 + $0x47] sm:$0xff]  ;;  %v324_v44 = vld [vmem:[#allocation2 + $0x11] sm:$0xff]  ;;  %v325_v58 = vld [vmem:[#allocation2 + $0x19] sm:$0xff] }
  0x42   :  { %1282 = vmatpush3.msra.mxu1 %v125_v18  ;;  %1245 = vmatprep.subr.mxu0 %v145_v19  ;;  %v339_v47 = vld [vmem:[#allocation6 + $0x150] sm:$0xff]  ;;  %v337_v49 = vld [vmem:[#allocation6 + $0x140] sm:$0xff]  ;;  %v336_v50 = vld [vmem:[#allocation6 + $0x138] sm:$0xff] }
  0x43   :  { %1283 = vmatprep.subr.mxu1 %v124_v20  ;;  %1246 = vmatpush3.msra.mxu0 %v145_v19  ;;  %v335_v51 = vld [vmem:[#allocation6 + $0x130] sm:$0xff]  ;;  %v334_v52 = vld [vmem:[#allocation6 + $0x128] sm:$0xff]  ;;  %v333_v53 = vld [vmem:[#allocation6 + $0x120] sm:$0xff] }
  0x44   :  { %1284 = vmatpush3.msra.mxu1 %v124_v20  ;;  %1247 = vmatprep.subr.mxu0 %v144_v22  ;;  %v332_v54 = vld [vmem:[#allocation6 + $0x118] sm:$0xff]  ;;  %v331_v55 = vld [vmem:[#allocation6 + $0x110] sm:$0xff]  ;;  %v330_v56 = vld [vmem:[#allocation6 + $0x108] sm:$0xff] }
  0x45   :  { %1285 = vmatprep.subr.mxu1 %v123_v23  ;;  %1248 = vmatpush3.msra.mxu0 %v144_v22  ;;  %v329_v57 = vld [vmem:[#allocation6 + $0x100] sm:$0xff]  ;;  %v327_v60 = vld [vmem:[#allocation2 + $0x49] sm:$0xff]  ;;  %v1749_v61 = vld [vmem:[#allocation9 + $0x78] sm:$0xff] }
  0x46   :  { %1286 = vmatpush3.msra.mxu1 %v123_v23  ;;  %1249 = vmatprep.subr.mxu0 %v143_v25  ;;  %v326_v59 = vld [vmem:[#allocation2 + $0x41] sm:$0xff]  ;;  %v1751_v62 = vld [vmem:[#allocation9 + $0x70] sm:$0xff]  ;;  %v1765_v2 = vld [vmem:[#allocation9 + $0x58] sm:$0xff] }
  0x47   :  { %1287 = vmatprep.subr.mxu1 %v122_v26  ;;  %1250 = vmatpush3.msra.mxu0 %v143_v25  ;;  %v1757_v63 = vld [vmem:[#allocation9 + $0x68] sm:$0xff]  ;;  %v1761_v1 = vld [vmem:[#allocation9 + $0x60] sm:$0xff]  ;;  %v1769_v3 = vld [vmem:[#allocation9 + $0x50] sm:$0xff] }
  0x48   :  { %1288 = vmatpush3.msra.mxu1 %v122_v26  ;;  %1251 = vmatprep.subr.mxu0 %v142_v27  ;;  %v1773_v4 = vld [vmem:[#allocation9 + $0x48] sm:$0xff]  ;;  %v1777_v5 = vld [vmem:[#allocation9 + $0x40] sm:$0xff]  ;;  %v1781_v6 = vld [vmem:[#allocation9 + $0x38] sm:$0xff] }
  0x49   :  { %1289 = vmatprep.subr.mxu1 %v121_v28  ;;  %1252 = vmatpush3.msra.mxu0 %v142_v27  ;;  %v1785_v7 = vld [vmem:[#allocation9 + $0x30] sm:$0xff]  ;;  %v1789_v8 = vld [vmem:[#allocation9 + $0x28] sm:$0xff]  ;;  %v1793_v9 = vld [vmem:[#allocation9 + $0x20] sm:$0xff] }
  0x4a   :  { %1290 = vmatpush3.msra.mxu1 %v121_v28  ;;  %1253 = vmatprep.subr.mxu0 %v141_v29  ;;  %v1796_v10 = vld [vmem:[#allocation9 + $0x18] sm:$0xff]  ;;  %v1799_v11 = vld [vmem:[#allocation9 + $0x10] sm:$0xff]  ;;  %v1805_v12 = vld [vmem:[#allocation9 + $0x8] sm:$0xff] }
  0x4b   :  { %1291 = vmatprep.subr.mxu1 %v120_v30  ;;  %1254 = vmatpush3.msra.mxu0 %v141_v29  ;;  %v1809_v13 = vld [vmem:[#allocation9] sm:$0xff] }
  0x4c   :  { %1292 = vmatpush3.msra.mxu1 %v120_v30  ;;  %1255 = vmatprep.subr.mxu0 %v140_v31 }
  0x4d   :  { %1293 = vmatprep.subr.mxu1 %v119_v32  ;;  %1256 = vmatpush3.msra.mxu0 %v140_v31 }
  0x4e   :  { %1294 = vmatpush3.msra.mxu1 %v119_v32  ;;  %1257 = vmatprep.subr.mxu0 %v139_v33 }
  0x4f   :  { %1295 = vmatprep.subr.mxu1 %v118_v34  ;;  %1258 = vmatpush3.msra.mxu0 %v139_v33 }
  0x50   :  { %1296 = vmatpush3.msra.mxu1 %v118_v34  ;;  %1259 = vmatprep.subr.mxu0 %v138_v35 }
  0x51   :  { %1297 = vmatprep.subr.mxu1 %v117_v36  ;;  %1260 = vmatpush3.msra.mxu0 %v138_v35 }
  0x52   :  { %1261 = vmatprep.mubr.f32.mxu0 %v1732_v15  ;;  %1298 = vmatpush3.msra.mxu1 %v117_v36 }
  0x53   :  { %1299 = vmatprep.mubr.f32.mxu1 %v113_v37  ;;  %1262 = vmatmul.mubr.f32.vlgmr.msra.gmra.mxu0 %v1735_v16 }
  0x54   :  { %1300 = vmatmul.mubr.f32.vlgmr.msra.gmra.mxu1 %v114_v38  ;;  %1305 = vmatprep.subr.mxu0 %v344_v39 }
  0x55   :  { %1264 = vmatprep.mubr.f32.mxu0 %v1738_v21  ;;  %1306 = vmatpush3.msra.mxu0 %v344_v39 }
  0x56   :  { %1302 = vmatprep.mubr.f32.mxu1 %v115_v40  ;;  %1307 = vmatprep.subr.mxu0 %v343_v41 }
  0x57   :  { %1343 = vmatprep.subr.mxu1 %v1655_v0  ;;  %1308 = vmatpush3.msra.mxu0 %v343_v41 }
  0x58   :  { %1303 = vmatmul.mubr.f32.gmra.mxu1 %v116_v42  ;;  %1309 = vmatprep.subr.mxu0 %v342_v43 }
  0x59   :  { %1265 = vmatmul.mubr.f32.gmra.mxu0 %v1741_v24  ;;  %1344 = vmatpush3.msra.mxu1 %v1749_v61 }
  0x5a   :  { %1310 = vmatpush3.msra.mxu0 %v342_v43  ;;  %1337 = vmatprep.mubr.f32.mxu0 %v324_v44 }
  0x5b   :  { %1311 = vmatprep.subr.mxu0 %v341_v45  ;;  %1345 = vmatprep.subr.mxu1 %v1655_v0 }
  0x5c   :  { %1312 = vmatpush3.msra.mxu0 %v341_v45  ;;  %1346 = vmatpush3.msra.mxu1 %v1751_v62 }
  0x5d   :  { %1313 = vmatprep.subr.mxu0 %v340_v46  ;;  %1347 = vmatprep.subr.mxu1 %v1655_v0 }
  0x5e   :  { %1314 = vmatpush3.msra.mxu0 %v340_v46  ;;  %1348 = vmatpush3.msra.mxu1 %v1757_v63 }
  0x5f   :  { %1315 = vmatprep.subr.mxu0 %v339_v47  ;;  %1349 = vmatprep.subr.mxu1 %v1655_v0 }
  0x60   :  { %1316 = vmatpush3.msra.mxu0 %v339_v47  ;;  %1350 = vmatpush3.msra.mxu1 %v1761_v1 }
  0x61   :  { %1317 = vmatprep.subr.mxu0 %v338_v48  ;;  %1351 = vmatprep.subr.mxu1 %v1655_v0 }
  0x62   :  { %1318 = vmatpush3.msra.mxu0 %v338_v48  ;;  %1352 = vmatpush3.msra.mxu1 %v1765_v2 }
  0x63   :  { %1319 = vmatprep.subr.mxu0 %v337_v49  ;;  %1353 = vmatprep.subr.mxu1 %v1655_v0 }
  0x64   :  { %1320 = vmatpush3.msra.mxu0 %v337_v49  ;;  %1354 = vmatpush3.msra.mxu1 %v1769_v3 }
  0x65   :  { %1321 = vmatprep.subr.mxu0 %v336_v50  ;;  %1355 = vmatprep.subr.mxu1 %v1655_v0 }
  0x66   :  { %1322 = vmatpush3.msra.mxu0 %v336_v50  ;;  %1356 = vmatpush3.msra.mxu1 %v1773_v4 }
  0x67   :  { %1323 = vmatprep.subr.mxu0 %v335_v51  ;;  %1357 = vmatprep.subr.mxu1 %v1655_v0 }
  0x68   :  { %1324 = vmatpush3.msra.mxu0 %v335_v51  ;;  %1358 = vmatpush3.msra.mxu1 %v1777_v5 }
  0x69   :  { %1325 = vmatprep.subr.mxu0 %v334_v52  ;;  %1359 = vmatprep.subr.mxu1 %v1655_v0 }
  0x6a   :  { %1326 = vmatpush3.msra.mxu0 %v334_v52  ;;  %1360 = vmatpush3.msra.mxu1 %v1781_v6 }
  0x6b   :  { %1327 = vmatprep.subr.mxu0 %v333_v53  ;;  %1361 = vmatprep.subr.mxu1 %v1655_v0 }
  0x6c   :  { %1328 = vmatpush3.msra.mxu0 %v333_v53  ;;  %1362 = vmatpush3.msra.mxu1 %v1785_v7 }
  0x6d   :  { %1329 = vmatprep.subr.mxu0 %v332_v54  ;;  %1363 = vmatprep.subr.mxu1 %v1655_v0 }
  0x6e   :  { %1330 = vmatpush3.msra.mxu0 %v332_v54  ;;  %1364 = vmatpush3.msra.mxu1 %v1789_v8 }
  0x6f   :  { %1331 = vmatprep.subr.mxu0 %v331_v55  ;;  %1365 = vmatprep.subr.mxu1 %v1655_v0 }
  0x70   :  { %1332 = vmatpush3.msra.mxu0 %v331_v55  ;;  %1366 = vmatpush3.msra.mxu1 %v1793_v9 }
  0x71   :  { %1333 = vmatprep.subr.mxu0 %v330_v56  ;;  %1367 = vmatprep.subr.mxu1 %v1655_v0 }
  0x72   :  { %1334 = vmatpush3.msra.mxu0 %v330_v56  ;;  %1375 = vmatprep.mubr.msk.f32.mxu1 %vm1656_vm0, %v1655_v0 }
  0x73   :  { %1335 = vmatprep.subr.mxu0 %v329_v57  ;;  %1368 = vmatpush3.msra.mxu1 %v1796_v10 }
  0x74   :  { %1336 = vmatpush3.msra.mxu0 %v329_v57  ;;  %1369 = vmatprep.subr.mxu1 %v1655_v0 }
  0x75   :  { %1338 = vmatmul.mubr.f32.vlgmr.msra.gmra.mxu0 %v325_v58  ;;  %1370 = vmatpush3.msra.mxu1 %v1799_v11 }
  0x76   :  { %1340 = vmatprep.mubr.f32.mxu0 %v326_v59  ;;  %1371 = vmatprep.subr.mxu1 %v1655_v0 }
  0x77   :  { %1372 = vmatpush3.msra.mxu1 %v1805_v12 }
  0x78   :  { %1373 = vmatprep.subr.mxu1 %v1655_v0 }
  0x79   :  { %1341 = vmatmul.mubr.f32.gmra.mxu0 %v327_v60  ;;  %1374 = vmatpush3.msra.mxu1 %v1809_v13 }
 0x113   :  { %v1263_v14 = vpop.f32.mrf.mxu0 }
 0x114   :  { %v1301_v17 = vpop.f32.mrf.mxu1 }
 0x115   :  { %v220_v18 = vpop.f32.mrf.mxu0  ;;  %v311_v26 = vadd.f32 %v1301_v17, %v1263_v14  ;;  %v625_v14 = vld [vmem:[#allocation8 + $0xf8] sm:$0xff]  ;;  %v624_v17 = vld [vmem:[#allocation8 + $0xf0] sm:$0xff] }
 0x116   :  { %v305_v20 = vpop.f32.mrf.mxu1  ;;  %1378 = vmatprep.subr.mxu0 %v625_v14 }
 0x117   :  { %v306_v27 = vadd.f32 %v305_v20, %v220_v18  ;;  %1379 = vmatpush3.msra.mxu0 %v625_v14  ;;  %v623_v18 = vld [vmem:[#allocation8 + $0xe8] sm:$0xff]  ;;  %v621_v20 = vld [vmem:[#allocation8 + $0xd8] sm:$0xff]  ;;  %v1657_v14 = vmov 1966171168  }
 0x118   :  { %v1304_v22 = vpop.f32.mrf.mxu1  ;;  %1380 = vmatprep.subr.mxu0 %v624_v17 }
 0x119   :  { %v1266_v19 = vpop.f32.mrf.mxu0  ;;  %1381 = vmatpush3.msra.mxu0 %v624_v17  ;;  %v539_v17 = vunpack.c.l.s4 %v1657_v14  ;;  %v807_v14 = vld [vmem:[#allocation8 + $0x130] sm:$0xff] }
 0x11a   :  { %v315_v28 = vpop.f32.mrf.mxu1  ;;  %v321_v33 = vadd.f32 %v1304_v22, %v1266_v19  ;;  %1382 = vmatprep.subr.mxu0 %v623_v18  ;;  %v622_v19 = vld [vmem:[#allocation8 + $0xe0] sm:$0xff]  ;;  %v604_v22 = vld [vmem:[#allocation8 + $0x78] sm:$0xff] }
 0x11b   :  { %v230_v23 = vpop.f32.mrf.mxu0  ;;  %1383 = vmatpush3.msra.mxu0 %v623_v18  ;;  %1416 = vmatprep.subr.mxu1 %v604_v22  ;;  %v541_v18 = vlaneseq }
 0x11c   :  { %v316_v34 = vadd.f32 %v315_v28, %v230_v23  ;;  %1384 = vmatprep.subr.mxu0 %v622_v19  ;;  %v620_v23 = vld [vmem:[#allocation8 + $0xd0] sm:$0xff]  ;;  %v618_v28 = vld [vmem:[#allocation8 + $0xc0] sm:$0xff] }
 0x11d   :  { %1385 = vmatpush3.msra.mxu0 %v622_v19  ;;  %v540_v19 = vunpack.c.0.s8 %v539_v17 }
 0x11e   :  { %1386 = vmatprep.subr.mxu0 %v621_v20 }
 0x11f   :  { %1387 = vmatpush3.msra.mxu0 %v621_v20  ;;  %v542_v20 = vshrl.u32 %v541_v18, 7 }
 0x120   :  { %1388 = vmatprep.subr.mxu0 %v620_v23 }
 0x121   :  { %1389 = vmatpush3.msra.mxu0 %v620_v23 }
 0x135   :  { %v1339_v25 = vpop.f32.mrf.mxu0 }
 0x136   :  { %v1814_v30 = vadd.f32 %v1339_v25, %v311_v26  ;;  %v603_v25 = vld [vmem:[#allocation8 + $0x70] sm:$0xff]  ;;  %v619_v26 = vld [vmem:[#allocation8 + $0xc8] sm:$0xff] }
 0x137   :  { %v411_v29 = vpop.f32.mrf.mxu0  ;;  %1390 = vmatprep.subr.mxu0 %v619_v26 }
 0x138   :  { %v1816_v31 = vadd.f32 %v411_v29, %v306_v27  ;;  %v446_v37 = vmul.f32 %v1814_v30, %v1814_v30  ;;  %v602_v27 = vld [vmem:[#allocation8 + $0x68] sm:$0xff]  ;;  %1391 = vmatpush3.msra.mxu0 %v619_v26  ;;  %v601_v29 = vld [vmem:[#allocation8 + $0x60] sm:$0xff] }
 0x139   :  { %v1342_v32 = vpop.f32.mrf.mxu0  ;;  %1392 = vmatprep.subr.mxu0 %v618_v28 }
 0x13a   :  { %v445_v35 = vmul.f32 %v1816_v31, %v1816_v31  ;;  %v436_v38 = vadd.f32 %v1814_v30, %v1816_v31  ;;  %v1824_v39 = vadd.f32 %v1342_v32, %v321_v33  ;;  %1393 = vmatpush3.msra.mxu0 %v618_v28  ;;  %v617_v32 = vld [vmem:[#allocation8 + $0xb8] sm:$0xff] }
 0x13b   :  { %v421_v36 = vpop.f32.mrf.mxu0  ;;  %v600_v33 = vld [vmem:[#allocation8 + $0x58] sm:$0xff]  ;;  %1394 = vmatprep.subr.mxu0 %v617_v32 }
 0x13c   :  { %v1826_v40 = vadd.f32 %v421_v36, %v316_v34  ;;  %v449_v41 = vadd.f32 %v446_v37, %v445_v35  ;;  %v448_v44 = vmul.f32 %v1824_v39, %v1824_v39  ;;  %1395 = vmatpush3.msra.mxu0 %v617_v32  ;;  %v616_v34 = vld [vmem:[#allocation8 + $0xb0] sm:$0xff]  ;;  %v615_v36 = vld [vmem:[#allocation8 + $0xa8] sm:$0xff] }
 0x13d   :  { %v599_v35 = vld [vmem:[#allocation8 + $0x50] sm:$0xff]  ;;  %1396 = vmatprep.subr.mxu0 %v616_v34  ;;  %v598_v37 = vld [vmem:[#allocation8 + $0x48] sm:$0xff] }
 0x13e   :  { %v437_v42 = vadd.f32 %v436_v38, %v1826_v40  ;;  %v447_v43 = vmul.f32 %v1826_v40, %v1826_v40  ;;  %1397 = vmatpush3.msra.mxu0 %v616_v34  ;;  %v614_v38 = vld [vmem:[#allocation8 + $0xa0] sm:$0xff] }
 0x13f   :  { %1398 = vmatprep.subr.mxu0 %v615_v36 }
 0x140   :  { %v438_v45 = vadd.f32 %v437_v42, %v1824_v39  ;;  %v450_v46 = vadd.f32 %v449_v41, %v447_v43  ;;  %1399 = vmatpush3.msra.mxu0 %v615_v36  ;;  %v597_v41 = vld [vmem:[#allocation8 + $0x40] sm:$0xff]  ;;  %v613_v42 = vld [vmem:[#allocation8 + $0x98] sm:$0xff] }
 0x141   :  { %1400 = vmatprep.subr.mxu0 %v614_v38  ;;  %v596_v43 = vld [vmem:[#allocation8 + $0x38] sm:$0xff] }
 0x142   :  { %v439_v47 = vrot.slane %v438_v45, 4  ;;  %v451_v48 = vadd.f32 %v450_v46, %v448_v44  ;;  %1401 = vmatpush3.msra.mxu0 %v614_v38  ;;  %v612_v44 = vld [vmem:[#allocation8 + $0x90] sm:$0xff]  ;;  %v611_v46 = vld [vmem:[#allocation8 + $0x88] sm:$0xff] }
 0x143   :  { %1402 = vmatprep.subr.mxu0 %v613_v42 }
 0x144   :  { %v440_v49 = vadd.f32 %v439_v47, %v438_v45  ;;  %v452_v50 = vrot.slane %v451_v48, 4  ;;  %1403 = vmatpush3.msra.mxu0 %v613_v42  ;;  %v595_v45 = vld [vmem:[#allocation8 + $0x30] sm:$0xff]  ;;  %v594_v47 = vld [vmem:[#allocation8 + $0x28] sm:$0xff] }
 0x145   :  { %1404 = vmatprep.subr.mxu0 %v612_v44 }
 0x146   :  { %v441_v51 = vrot.slane %v440_v49, 2  ;;  %v453_v52 = vadd.f32 %v452_v50, %v451_v48  ;;  %1405 = vmatpush3.msra.mxu0 %v612_v44  ;;  %v610_v48 = vld [vmem:[#allocation8 + $0x80] sm:$0xff]  ;;  %v592_v50 = vld [vmem:[#allocation8 + $0x18] sm:$0xff] }
 0x147   :  { %1406 = vmatprep.subr.mxu0 %v611_v46 }
 0x148   :  { %v442_v53 = vadd.f32 %v441_v51, %v440_v49  ;;  %v454_v54 = vrot.slane %v453_v52, 2  ;;  %1407 = vmatpush3.msra.mxu0 %v611_v46  ;;  %v593_v49 = vld [vmem:[#allocation8 + $0x20] sm:$0xff]  ;;  %v591_v51 = vld [vmem:[#allocation8 + $0x10] sm:$0xff] }
 0x149   :  { %1408 = vmatprep.subr.mxu0 %v610_v48 }
 0x14a   :  { %v443_v55 = vrot.slane %v442_v53, 1  ;;  %v455_v56 = vadd.f32 %v454_v54, %v453_v52  ;;  %1409 = vmatpush3.msra.mxu0 %v610_v48  ;;  %v816_v52 = vld [vmem:[#allocation8 + $0x178] sm:$0xff]  ;;  %v589_v54 = vld [vmem:[#allocation8] sm:$0xff] }
 0x14b   :  { %1454 = vmatprep.subr.mxu0 %v816_v52 }
 0x14c   :  { %v456_v57 = vrot.slane %v455_v56, 1  ;;  %v444_v58 = vadd.f32 %v443_v55, %v442_v53  ;;  %v590_v53 = vld [vmem:[#allocation8 + $0x8] sm:$0xff] }
 0x14e   :  { %v457_v59 = vadd.f32 %v456_v57, %v455_v56 }
 0x150   :  { %v459_v60 = vsel %vm458_vm1, %v444_v58, %v457_v59 }
 0x151   :  { %1376 = vmatmul.mubr.f32.vlgmr.msra.gmra.mxu1 %v459_v60 }
 0x152   :  { %1417 = vmatpush3.msra.mxu1 %v604_v22  ;;  %v1836_v22 = vsub.s32 %v540_v19, %v542_v20 }
 0x153   :  { %1418 = vmatprep.subr.mxu1 %v603_v25 }
 0x154   :  { %1419 = vmatpush3.msra.mxu1 %v603_v25 }
 0x155   :  { %1420 = vmatprep.subr.mxu1 %v602_v27 }
 0x156   :  { %1421 = vmatpush3.msra.mxu1 %v602_v27  ;;  %v434_v27 = vld [vmem:[%s1911_s3] sm:$0x1] }
 0x157   :  { %1422 = vmatprep.subr.mxu1 %v601_v29 }
 0x158   :  { %1423 = vmatpush3.msra.mxu1 %v601_v29  ;;  %v1843_v29 = vsub.s32 0, %v542_v20 }
 0x159   :  { %1424 = vmatprep.subr.mxu1 %v600_v33 }
 0x15a   :  { %1425 = vmatpush3.msra.mxu1 %v600_v33  ;;  %v435_v33 = vld [vmem:[%s1912_s4] sm:$0x1] }
 0x15b   :  { %1426 = vmatprep.subr.mxu1 %v599_v35 }
 0x15c   :  { %1427 = vmatpush3.msra.mxu1 %v599_v35 }
 0x15d   :  { %1428 = vmatprep.subr.mxu1 %v598_v37 }
 0x15e   :  { %1429 = vmatpush3.msra.mxu1 %v598_v37 }
 0x15f   :  { %1430 = vmatprep.subr.mxu1 %v597_v41 }
 0x160   :  { %1431 = vmatpush3.msra.mxu1 %v597_v41 }
 0x161   :  { %1432 = vmatprep.subr.mxu1 %v596_v43 }
 0x162   :  { %1433 = vmatpush3.msra.mxu1 %v596_v43 }
 0x163   :  { %1434 = vmatprep.subr.mxu1 %v595_v45 }
 0x164   :  { %1435 = vmatpush3.msra.mxu1 %v595_v45 }
 0x165   :  { %1436 = vmatprep.subr.mxu1 %v594_v47 }
 0x166   :  { %1437 = vmatpush3.msra.mxu1 %v594_v47 }
 0x167   :  { %1438 = vmatprep.subr.mxu1 %v593_v49 }
 0x168   :  { %1439 = vmatpush3.msra.mxu1 %v593_v49 }
 0x169   :  { %1440 = vmatprep.subr.mxu1 %v592_v50 }
 0x16a   :  { %1441 = vmatpush3.msra.mxu1 %v592_v50 }
 0x16b   :  { %1442 = vmatprep.subr.mxu1 %v591_v51 }
 0x16c   :  { %1443 = vmatpush3.msra.mxu1 %v591_v51 }
 0x16d   :  { %1444 = vmatprep.subr.mxu1 %v590_v53 }
 0x16e   :  { %1445 = vmatpush3.msra.mxu1 %v590_v53 }
 0x16f   :  { %1446 = vmatprep.subr.mxu1 %v589_v54 }
 0x170   :  { %1447 = vmatpush3.msra.mxu1 %v589_v54  ;;  %v812_v54 = vld [vmem:[#allocation8 + $0x158] sm:$0xff] }
 0x171   :  { %1492 = vmatprep.subr.mxu1 %v1655_v0 }
 0x211   :  { %v526_v55 = vpop.f32.mrf.mxu1 }
 0x212   :  { %v530_v56 = vmul.f32 %v526_v55, %v526_v55 }
 0x213   :  { %v1377_v57 = vpop.f32.mrf.mxu1 }
 0x214   :  { %v532_v58 = vrot.slane %v530_v56, 7  ;;  %v811_v57 = vld [vmem:[#allocation8 + $0x150] sm:$0xff] }
 0x216   :  { %v534_v59 = vsub.f32 %v526_v55, %v532_v58 }
 0x218   :  { %v535_v60 = vadd.f32 1e-05, %v534_v59  ;;  %v809_v59 = vld [vmem:[#allocation8 + $0x140] sm:$0xff] }
 0x21a   :  { %1537 = vrsqrt.f32 %v535_v60  ;;  %v808_v60 = vld [vmem:[#allocation8 + $0x138] sm:$0xff] }
 0x227   :  { %v1538_v23 = vpop.eup %1537 }
 0x228   :  { %v544_v25 = vrot.slane %v1538_v23, %v1836_v22 }
 0x22a   :  { %v545_v26 = vcombine.high %v544_v25, %v544_v25 }
 0x22c   :  { %v552_v28 = vrot.slane %v545_v26, %v1836_v22 }
 0x22e   :  { %v554_v32 = vmul.f32 %v552_v28, %v434_v27 }
 0x230   :  { %v555_v34 = vmul.f32 %v554_v32, %v526_v55  ;;  %v561_v35 = vrot.slane %v554_v32, %v1843_v29 }
 0x232   :  { %v556_v36 = vsub.f32 %v435_v33, %v555_v34  ;;  %v563_v37 = vmul.f32 %v561_v35, %v1816_v31  ;;  %v564_v38 = vmul.f32 %v561_v35, %v1814_v30  ;;  %v565_v41 = vmul.f32 %v561_v35, %v1826_v40  ;;  %v815_v30 = vld [vmem:[#allocation8 + $0x170] sm:$0xff]  ;;  %v814_v31 = vld [vmem:[#allocation8 + $0x168] sm:$0xff] }
 0x233   :  { %v566_v42 = vmul.f32 %v561_v35, %v1824_v39  ;;  %v813_v39 = vld [vmem:[#allocation8 + $0x160] sm:$0xff] }
 0x234   :  { %v571_v43 = vrot.slane %v556_v36, %v1843_v29 }
 0x236   :  { %v573_v44 = vadd.f32 %v571_v43, %v563_v37  ;;  %v574_v45 = vadd.f32 %v571_v43, %v564_v38  ;;  %v575_v46 = vadd.f32 %v571_v43, %v565_v41  ;;  %v576_v47 = vadd.f32 %v571_v43, %v566_v42 }
 0x238   :  { %v577_v48 = vmax.f32 %v573_v44, 0.0  ;;  %v578_v49 = vmax.f32 %v574_v45, 0.0  ;;  %v579_v50 = vmax.f32 %v575_v46, 0.0  ;;  %v580_v51 = vmax.f32 %v576_v47, 0.0 }
 0x23a   :  { %581 = vst [vmem:[#allocation2 + $0x10] sm:$0xff] %v577_v48  ;;  %582 = vst [vmem:[#allocation2 + $0x18] sm:$0xff] %v578_v49  ;;  %1410 = vmatprep.mubr.f32.mxu0 %v577_v48 }
 0x23b   :  { %583 = vst [vmem:[#allocation2 + $0x40] sm:$0xff] %v579_v50  ;;  %584 = vst [vmem:[#allocation2 + $0x48] sm:$0xff] %v580_v51  ;;  %1411 = vmatmul.mubr.f32.vlgmr.msra.gmra.mxu0 %v578_v49 }
 0x23c   :  { %1455 = vmatpush3.msra.mxu0 %v816_v52  ;;  %1413 = vmatprep.mubr.f32.mxu0 %v579_v50  ;;  %v810_v52 = vld [vmem:[#allocation8 + $0x148] sm:$0xff] }
 0x23d   :  { %1456 = vmatprep.subr.mxu0 %v815_v30 }
 0x23e   :  { %1457 = vmatpush3.msra.mxu0 %v815_v30 }
 0x23f   :  { %1458 = vmatprep.subr.mxu0 %v814_v31  ;;  %1414 = vmatmul.mubr.f32.gmra.mxu0 %v580_v51 }
 0x240   :  { %1459 = vmatpush3.msra.mxu0 %v814_v31 }
 0x241   :  { %v585_v40 = vld [vmem:[#allocation2 + $0xf] sm:$0xff]  ;;  %v586_v53 = vld [vmem:[#allocation2 + $0x17] sm:$0xff]  ;;  %1460 = vmatprep.subr.mxu0 %v813_v39 }
 0x242   :  { %1448 = vmatprep.mubr.f32.mxu1 %v585_v40  ;;  %v796_v55 = vld [vmem:[#allocation2 + $0x11] sm:$0xff]  ;;  %1461 = vmatpush3.msra.mxu0 %v813_v39  ;;  %v587_v56 = vld [vmem:[#allocation2 + $0x3f] sm:$0xff]  ;;  %v588_v58 = vld [vmem:[#allocation2 + $0x47] sm:$0xff] }
 0x243   :  { %1449 = vmatmul.mubr.f32.vlgmr.msra.gmra.mxu1 %v586_v53  ;;  %1486 = vmatprep.mubr.f32.mxu0 %v796_v55 }
 0x244   :  { %1451 = vmatprep.mubr.f32.mxu1 %v587_v56  ;;  %1462 = vmatprep.subr.mxu0 %v812_v54 }
 0x245   :  { %1463 = vmatpush3.msra.mxu0 %v812_v54  ;;  %1493 = vmatpush3.msra.mxu1 %v1749_v61  ;;  %v806_v61 = vld [vmem:[#allocation8 + $0x128] sm:$0xff] }
 0x246   :  { %1464 = vmatprep.subr.mxu0 %v811_v57  ;;  %1494 = vmatprep.subr.mxu1 %v1655_v0 }
 0x247   :  { %1452 = vmatmul.mubr.f32.gmra.mxu1 %v588_v58  ;;  %1465 = vmatpush3.msra.mxu0 %v811_v57 }
 0x248   :  { %1466 = vmatprep.subr.mxu0 %v810_v52  ;;  %1495 = vmatpush3.msra.mxu1 %v1751_v62  ;;  %v805_v62 = vld [vmem:[#allocation8 + $0x120] sm:$0xff] }
 0x249   :  { %1467 = vmatpush3.msra.mxu0 %v810_v52  ;;  %1496 = vmatprep.subr.mxu1 %v1655_v0 }
 0x24a   :  { %1468 = vmatprep.subr.mxu0 %v809_v59  ;;  %1497 = vmatpush3.msra.mxu1 %v1757_v63  ;;  %v804_v63 = vld [vmem:[#allocation8 + $0x118] sm:$0xff] }
 0x24b   :  { %1469 = vmatpush3.msra.mxu0 %v809_v59  ;;  %1498 = vmatprep.subr.mxu1 %v1655_v0 }
 0x24c   :  { %1470 = vmatprep.subr.mxu0 %v808_v60  ;;  %1499 = vmatpush3.msra.mxu1 %v1761_v1  ;;  %v803_v1 = vld [vmem:[#allocation8 + $0x110] sm:$0xff] }
 0x24d   :  { %1471 = vmatpush3.msra.mxu0 %v808_v60  ;;  %1500 = vmatprep.subr.mxu1 %v1655_v0 }
 0x24e   :  { %1472 = vmatprep.subr.mxu0 %v807_v14  ;;  %1501 = vmatpush3.msra.mxu1 %v1765_v2  ;;  %v802_v2 = vld [vmem:[#allocation8 + $0x108] sm:$0xff] }
 0x24f   :  { %1473 = vmatpush3.msra.mxu0 %v807_v14  ;;  %1502 = vmatprep.subr.mxu1 %v1655_v0 }
 0x250   :  { %1474 = vmatprep.subr.mxu0 %v806_v61  ;;  %1503 = vmatpush3.msra.mxu1 %v1769_v3  ;;  %v801_v3 = vld [vmem:[#allocation8 + $0x100] sm:$0xff] }
 0x251   :  { %1475 = vmatpush3.msra.mxu0 %v806_v61  ;;  %1504 = vmatprep.subr.mxu1 %v1655_v0 }
 0x252   :  { %1476 = vmatprep.subr.mxu0 %v805_v62  ;;  %1505 = vmatpush3.msra.mxu1 %v1773_v4  ;;  %v797_v4 = vld [vmem:[#allocation2 + $0x19] sm:$0xff] }
 0x253   :  { %1477 = vmatpush3.msra.mxu0 %v805_v62  ;;  %1506 = vmatprep.subr.mxu1 %v1655_v0 }
 0x254   :  { %1478 = vmatprep.subr.mxu0 %v804_v63  ;;  %1507 = vmatpush3.msra.mxu1 %v1777_v5  ;;  %v798_v5 = vld [vmem:[#allocation2 + $0x41] sm:$0xff] }
 0x255   :  { %1479 = vmatpush3.msra.mxu0 %v804_v63  ;;  %1508 = vmatprep.subr.mxu1 %v1655_v0 }
 0x256   :  { %1480 = vmatprep.subr.mxu0 %v803_v1  ;;  %1509 = vmatpush3.msra.mxu1 %v1781_v6  ;;  %v799_v6 = vld [vmem:[#allocation2 + $0x49] sm:$0xff] }
 0x257   :  { %1481 = vmatpush3.msra.mxu0 %v803_v1  ;;  %1510 = vmatprep.subr.mxu1 %v1655_v0  ;;  %v906_v1 = vld [vmem:[%s1913_s5] sm:$0x1]  ;;  %s1621_s5 = scalar_lea.vmem %s1062_s30, 512 }
 0x258   :  { %1482 = vmatprep.subr.mxu0 %v802_v2  ;;  %1511 = vmatpush3.msra.mxu1 %v1785_v7  ;;  %p1622_p6 = scmp.ne.s32.totalorder %s1062_s30, %s1621_s5  ;;  %p1627_p8 = scmp.lt.s32.totalorder %s1621_s5, %s1621_s5 }
 0x259   :  { %1483 = vmatpush3.msra.mxu0 %v802_v2  ;;  %1512 = vmatprep.subr.mxu1 %v1655_v0 }
 0x25a   :  { %1484 = vmatprep.subr.mxu0 %v801_v3  ;;  %1513 = vmatpush3.msra.mxu1 %v1789_v8  ;;  %p1628_p9 = por %p1627_p8, %p1626_p7 }
 0x25b   :  { %1485 = vmatpush3.msra.mxu0 %v801_v3  ;;  %1514 = vmatprep.subr.mxu1 %v1655_v0 }
 0x25c   :  { %1487 = vmatmul.mubr.f32.vlgmr.msra.gmra.mxu0 %v797_v4  ;;  %1515 = vmatpush3.msra.mxu1 %v1793_v9  ;;  %v907_v4 = vld [vmem:[%s1914_s6] sm:$0x1]  ;;  %p1629_p10 = pnand %p1628_p9, %p1622_p6 }
 0x25d   :  { %1489 = vmatprep.mubr.f32.mxu0 %v798_v5  ;;  %1516 = vmatprep.subr.mxu1 %v1655_v0 }
 0x25e   :  { %1517 = vmatpush3.msra.mxu1 %v1796_v10  ;;  %1524 = vmatprep.mubr.msk.f32.mxu1 %vm1656_vm0, %v1655_v0 }
 0x25f   :  { %1518 = vmatprep.subr.mxu1 %v1655_v0 }
 0x260   :  { %1490 = vmatmul.mubr.f32.gmra.mxu0 %v799_v6  ;;  %1519 = vmatpush3.msra.mxu1 %v1799_v11 }
 0x261   :  { %1520 = vmatprep.subr.mxu1 %v1655_v0 }
 0x262   :  { %1521 = vmatpush3.msra.mxu1 %v1805_v12 }
 0x263   :  { %1522 = vmatprep.subr.mxu1 %v1655_v0 }
 0x264   :  { %1523 = vmatpush3.msra.mxu1 %v1809_v13 }
 0x2fb   :  { %v1412_v7 = vpop.f32.mrf.mxu0 }
 0x2fd   :  { %v692_v9 = vpop.f32.mrf.mxu0 }
 0x2ff   :  { %v1415_v17 = vpop.f32.mrf.mxu0 }
 0x301   :  { %v702_v19 = vpop.f32.mrf.mxu0 }
 0x303   :  { %v1450_v8 = vpop.f32.mrf.mxu1 }
 0x304   :  { %v783_v23 = vadd.f32 %v1450_v8, %v1412_v7 }
 0x305   :  { %v777_v10 = vpop.f32.mrf.mxu1 }
 0x306   :  { %v778_v25 = vadd.f32 %v777_v10, %v692_v9 }
 0x307   :  { %v1453_v18 = vpop.f32.mrf.mxu1 }
 0x308   :  { %v793_v12 = vadd.f32 %v1453_v18, %v1415_v17 }
 0x309   :  { %v787_v26 = vpop.f32.mrf.mxu1 }
 0x30a   :  { %v788_v33 = vadd.f32 %v787_v26, %v702_v19 }
 0x31c   :  { %v1488_v20 = vpop.f32.mrf.mxu0 }
 0x31d   :  { %v903_v27 = vadd.f32 %v1488_v20, %v783_v23 }
 0x31e   :  { %v883_v11 = vpop.f32.mrf.mxu0 }
 0x31f   :  { %v902_v28 = vadd.f32 %v883_v11, %v778_v25  ;;  %v918_v13 = vmul.f32 %v903_v27, %v903_v27 }
 0x320   :  { %v1491_v32 = vpop.f32.mrf.mxu0 }
 0x321   :  { %v917_v0 = vmul.f32 %v902_v28, %v902_v28  ;;  %v908_v35 = vadd.f32 %v903_v27, %v902_v28  ;;  %v905_v36 = vadd.f32 %v1491_v32, %v793_v12 }
 0x322   :  { %v893_v34 = vpop.f32.mrf.mxu0 }
 0x323   :  { %v904_v37 = vadd.f32 %v893_v34, %v788_v33  ;;  %v921_v38 = vadd.f32 %v918_v13, %v917_v0  ;;  %v920_v43 = vmul.f32 %v905_v36, %v905_v36 }
 0x325   :  { %v909_v41 = vadd.f32 %v908_v35, %v904_v37  ;;  %v919_v42 = vmul.f32 %v904_v37, %v904_v37 }
 0x327   :  { %v910_v44 = vadd.f32 %v909_v41, %v905_v36  ;;  %v922_v45 = vadd.f32 %v921_v38, %v919_v42 }
 0x329   :  { %v911_v46 = vrot.slane %v910_v44, 4  ;;  %v923_v47 = vadd.f32 %v922_v45, %v920_v43 }
 0x32b   :  { %v912_v48 = vadd.f32 %v911_v46, %v910_v44  ;;  %v924_v49 = vrot.slane %v923_v47, 4 }
 0x32d   :  { %v913_v50 = vrot.slane %v912_v48, 2  ;;  %v925_v51 = vadd.f32 %v924_v49, %v923_v47 }
 0x32f   :  { %v914_v30 = vadd.f32 %v913_v50, %v912_v48  ;;  %v926_v31 = vrot.slane %v925_v51, 2 }
 0x331   :  { %v915_v39 = vrot.slane %v914_v30, 1  ;;  %v927_v40 = vadd.f32 %v926_v31, %v925_v51 }
 0x333   :  { %v928_v53 = vrot.slane %v927_v40, 1  ;;  %v916_v54 = vadd.f32 %v915_v39, %v914_v30 }
 0x335   :  { %v929_v55 = vadd.f32 %v928_v53, %v927_v40 }
 0x337   :  { %v930_v56 = vsel %vm458_vm1, %v916_v54, %v929_v55 }
 0x338   :  { %1525 = vmatmul.mubr.f32.vlgmr.msra.gmra.mxu1 %v930_v56 }
 0x3f8   :  { %v997_v57 = vpop.f32.mrf.mxu1 }
 0x3f9   :  { %v1001_v52 = vmul.f32 %v997_v57, %v997_v57 }
 0x3fa   :  { %v1526_v58 = vpop.f32.mrf.mxu1 }
 0x3fb   :  { %v1003_v59 = vrot.slane %v1001_v52, 7 }
 0x3fd   :  { %v1005_v60 = vsub.f32 %v997_v57, %v1003_v59 }
 0x3ff   :  { %v1006_v14 = vadd.f32 1e-05, %v1005_v60 }
 0x401   :  { %1539 = vrsqrt.f32 %v1006_v14 }
 0x40e   :  { %v1540_v61 = vpop.eup %1539 }
 0x40f   :  { %v1015_v62 = vrot.slane %v1540_v61, %v1836_v22 }
 0x411   :  { %v1016_v63 = vcombine.high %v1015_v62, %v1015_v62 }
 0x413   :  { %v1023_v2 = vrot.slane %v1016_v63, %v1836_v22 }
 0x415   :  { %v1025_v3 = vmul.f32 %v1023_v2, %v906_v1 }
 0x417   :  { %v1026_v5 = vmul.f32 %v1025_v3, %v997_v57  ;;  %v1032_v6 = vrot.slane %v1025_v3, %v1843_v29 }
 0x419   :  { %v1027_v7 = vsub.f32 %v907_v4, %v1026_v5  ;;  %v1034_v8 = vmul.f32 %v1032_v6, %v902_v28  ;;  %v1035_v10 = vmul.f32 %v1032_v6, %v903_v27  ;;  %v1036_v17 = vmul.f32 %v1032_v6, %v904_v37 }
 0x41a   :  { %v1037_v18 = vmul.f32 %v1032_v6, %v905_v36 }
 0x41b   :  { %v1042_v9 = vrot.slane %v1027_v7, %v1843_v29 }
 0x41d   :  { %v1044_v19 = vadd.f32 %v1042_v9, %v1034_v8  ;;  %v1045_v20 = vadd.f32 %v1042_v9, %v1035_v10  ;;  %v1046_v22 = vadd.f32 %v1042_v9, %v1036_v17  ;;  %v1047_v23 = vadd.f32 %v1042_v9, %v1037_v18 }
 0x41f   :  { %v1048_v25 = vadd.f32 %v1044_v19, %v1732_v15  ;;  %v1049_v26 = vadd.f32 %v1045_v20, %v1735_v16  ;;  %v1050_v11 = vadd.f32 %v1046_v22, %v1738_v21  ;;  %v1051_v32 = vadd.f32 %v1047_v23, %v1741_v24 }
 0x421   :  { %1052 = vst [vmem:[#allocation11] sm:$0xff] %v1048_v25  ;;  %1053 = vst [vmem:[#allocation11 + $0x8] sm:$0xff] %v1049_v26 }
 0x422   :  { %1054 = vst [vmem:[#allocation11 + $0x10] sm:$0xff] %v1050_v11  ;;  %1055 = vst [vmem:[#allocation11 + $0x18] sm:$0xff] %v1051_v32 }
 0x423   :  { %1632 = shalt.err (!%p1629_p10)
}
 0x424   :  { %1067 = dma.vmem_to_hbm [thread:$0]  %s1062_s30, 512, %s1916_s8, [#allocation5], %s1651_s10, %s1651_s10, %s1652_s11  }
 0x425   :  { %1647 = dma.done.wait [#allocation5], 512  }
 0x426   :  { %1648 = vsyncadd [#allocation5], 4294966784 }
 0x427   :  { %1071 = vsyncpa [#allocation4], 1 }
 0x428   :  { %1072 = vsyncpa [#allocation7], 1 }
 0x429   :  { %1073 = vsyncpa [#allocation10], 1 }
 0x42a   :  { %1074 = vsyncpa [#allocation5], 1 }

</bundles_post_ra>
